<compile_context>
chip_gen: v7x
topology: tpu7x:2x2x1
jax: 0.10.0
libtpu: 0.0.40
codegen_flags: <defaults>
</compile_context>

<pallas_src>
import functools

import jax
import jax.numpy as jnp
import numpy as np
from jax import lax
from jax.experimental import pallas as pl
from jax.experimental.pallas import tpu as pltpu


def _round_up(x, m):
    return ((x + m - 1) // m) * m


# Conservative VMEM budget for block sizing: fits v5e's 16 MiB scoped default
# and leaves headroom on v7x (64 MiB physical / 32 MiB scoped default).
_VMEM_BUDGET_BYTES = 12 * 1024 * 1024
_MAX_BLOCK_E = 16384        # lane-dim tile cap; per-step overhead fully amortized
_FUSED_MAX_N = 1024         # one-hot in-kernel gather only pays off for small tables


def _pick_block_e(E, bytes_per_edge, budget, requested=None):
    e_ceil = _round_up(E, 128)
    if requested is not None:
        return min(_round_up(requested, 128), e_ceil)
    be = budget // max(bytes_per_edge, 1)
    be = max(128, (be // 128) * 128)
    be = min(be, _MAX_BLOCK_E, e_ceil)
    # Megacore (v7x has 2 TensorCores): make sure the "parallel" edge grid axis
    # has at least 2 blocks so both cores get work.
    if e_ceil >= 256:
        be = min(be, _round_up((e_ceil + 1) // 2, 128))
    return be


# --------------------------------------------------------------------------- #
# Fused kernel (small tables): in-kernel renorm + one-hot MXU gather + dot.
# Edges live on the LANE axis; output is lane-dense (1, block_e).
# --------------------------------------------------------------------------- #
def _fused_decoder_kernel(src_idx_ref, dst_idx_ref, tab_ref, out_ref, *, as_logits):
    # torch.nn.Embedding(max_norm=1, norm_type=2): rows with ||row||_2 > 1 are
    # rescaled by 1 / (||row||_2 + 1e-7). Renorming table rows before the gather
    # is numerically identical to renorming the gathered rows.
    tab = tab_ref[...].astype(jnp.float32)                       # (D, N)
    nrm = jnp.sqrt(jnp.sum(tab * tab, axis=0, keepdims=True))    # (1, N)
    tab = tab * jnp.where(nrm > 1.0, 1.0 / (nrm + 1e-7), 1.0)

    n = tab.shape[1]
    src_idx = src_idx_ref[...]                                   # (1, block_e) int32
    dst_idx = dst_idx_ref[...]
    block_e = src_idx.shape[1]

    iota_n = lax.broadcasted_iota(jnp.int32, (n, block_e), 0)
    onehot_src = (iota_n == src_idx).astype(jnp.float32)         # (N, block_e)
    onehot_dst = (iota_n == dst_idx).astype(jnp.float32)

    # One-hot gather on the MXU; HIGHEST precision keeps the gathered f32 exact
    # (exactly one nonzero term per output element).
    src = jnp.dot(tab, onehot_src, preferred_element_type=jnp.float32,
                  precision=lax.Precision.HIGHEST)               # (D, block_e)
    dst = jnp.dot(tab, onehot_dst, preferred_element_type=jnp.float32,
                  precision=lax.Precision.HIGHEST)               # (D, block_e)

    prods = jnp.sum(src * dst, axis=0, keepdims=True)            # (1, block_e)
    out_ref[...] = prods if as_logits else jax.nn.sigmoid(prods)


# --------------------------------------------------------------------------- #
# Fallback kernels (large tables): renorm the table once, then XLA gather into
# the lane-major (D, E) layout feeding a lane-dense dot kernel.
# --------------------------------------------------------------------------- #
def _renorm_table_kernel(tab_ref, out_ref):
    x = tab_ref[...].astype(jnp.float32)                         # (block_n, D)
    nrm = jnp.sqrt(jnp.sum(x * x, axis=1, keepdims=True))        # (block_n, 1)
    out_ref[...] = x * jnp.where(nrm > 1.0, 1.0 / (nrm + 1e-7), 1.0)


def _renorm_embedding_table(table, block_n=512):
    N, D = table.shape
    block_n = min(block_n, _round_up(N, 8))
    n_pad = _round_up(N, block_n)
    if n_pad != N:
        table = jnp.pad(table, ((0, n_pad - N), (0, 0)))
    out = pl.pallas_call(
        _renorm_table_kernel,
        out_shape=jax.ShapeDtypeStruct((n_pad, D), jnp.float32),
        grid=(n_pad // block_n,),
        in_specs=[pl.BlockSpec((block_n, D), lambda i: (i, 0))],
        out_specs=pl.BlockSpec((block_n, D), lambda i: (i, 0)),
        compiler_params=pltpu.CompilerParams(dimension_semantics=("parallel",)),
    )(table)
    return out[:N]


def _dot_decoder_kernel(src_ref, dst_ref, out_ref, *, as_logits):
    src = src_ref[...]                                           # (D, block_e)
    dst = dst_ref[...]
    prods = jnp.sum(src * dst, axis=0, keepdims=True)            # (1, block_e)
    out_ref[...] = prods if as_logits else jax.nn.sigmoid(prods)


# --------------------------------------------------------------------------- #
# Forward wrapper
# --------------------------------------------------------------------------- #
def dot_product_decoder_forward(embedding_table, edges, as_logits=False,
                                block_e=None):
    """Forward pass of DotProductDecoder.

    embedding_table: (N, D) float32  -- the nn.Embedding weight
    edges:           (E, 2) int      -- [src_node, dst_node] index pairs
    returns:         (E,)   float32  -- probs (or logits if as_logits=True)
    """
    N, D = embedding_table.shape
    E = edges.shape[0]
    table = embedding_table.astype(jnp.float32)
    src_idx = edges[:, 0].astype(jnp.int32)
    dst_idx = edges[:, 1].astype(jnp.int32)

    table_bytes = N * D * 4
    fused = (N <= _FUSED_MAX_N) and (2 * table_bytes <= 2 * 1024 * 1024)

    if fused:
        # Per-edge VMEM: 2 one-hots (N each) + gathered src/dst (D each) +
        # compare temporaries (~N) + double-buffered idx/out (~8 words), f32.
        bytes_per_edge = 4 * (3 * N + 2 * D + 8)
        budget = _VMEM_BUDGET_BYTES - 2 * table_bytes
    else:
        # Per-edge VMEM: src/dst tiles double-buffered (4D) + out + temporaries.
        bytes_per_edge = 4 * (6 * D + 8)
        budget = _VMEM_BUDGET_BYTES

    blk = _pick_block_e(E, bytes_per_edge, budget, requested=block_e)
    e_pad = _round_up(E, blk)
    if e_pad != E:
        # Pad the tiny int32 index vectors (NOT the big gathered data).
        # Index 0 is a valid row; padded lanes are sliced off the output.
        src_idx = jnp.pad(src_idx, (0, e_pad - E))
        dst_idx = jnp.pad(dst_idx, (0, e_pad - E))

    grid = (e_pad // blk,)
    params = pltpu.CompilerParams(dimension_semantics=("parallel",))

    if fused:
        table_t = table.T                                        # (D, N), tiny
        out = pl.pallas_call(
            functools.partial(_fused_decoder_kernel, as_logits=as_logits),
            out_shape=jax.ShapeDtypeStruct((1, e_pad), jnp.float32),
            grid=grid,
            in_specs=[
                pl.BlockSpec((1, blk), lambda i: (0, i)),        # src indices
                pl.BlockSpec((1, blk), lambda i: (0, i)),        # dst indices
                pl.BlockSpec((D, N), lambda i: (0, 0)),          # whole table (VMEM-resident)
            ],
            out_specs=pl.BlockSpec((1, blk), lambda i: (0, i)),
            compiler_params=params,
        )(src_idx.reshape(1, e_pad), dst_idx.reshape(1, e_pad), table_t)
        return out[0, :E]

    # Fallback for big tables: renorm the table once (Pallas), XLA gather
    # straight into the lane-major (D, e_pad) layout, lane-dense dot kernel.
    # TODO(synk): fuse this path too via a manual-DMA gather (memory_space=pl.ANY
    # + make_async_copy per index block); kept on the well-supported gather path.
    table_t = _renorm_embedding_table(table).T                   # (D, N)
    src_t = jnp.take(table_t, src_idx, axis=1)                   # (D, e_pad)
    dst_t = jnp.take(table_t, dst_idx, axis=1)
    out = pl.pallas_call(
        functools.partial(_dot_decoder_kernel, as_logits=as_logits),
        out_shape=jax.ShapeDtypeStruct((1, e_pad), jnp.float32),
        grid=grid,
        in_specs=[
            pl.BlockSpec((D, blk), lambda i: (0, i)),
            pl.BlockSpec((D, blk), lambda i: (0, i)),
        ],
        out_specs=pl.BlockSpec((1, blk), lambda i: (0, i)),
        compiler_params=params,
    )(src_t, dst_t)
    return out[0, :E]


# --------------------------------------------------------------------------- #
# Pure-JAX reference mirroring the PyTorch forward exactly.
# --------------------------------------------------------------------------- #
def _reference_forward(embedding_table, edges, as_logits=False):
    def renorm(x):
        nrm = jnp.sqrt(jnp.sum(x * x, axis=1, keepdims=True))
        return x * jnp.where(nrm > 1.0, 1.0 / (nrm + 1e-7), 1.0)

    s = renorm(jnp.take(embedding_table, edges[:, 0], axis=0))
    d = renorm(jnp.take(embedding_table, edges[:, 1], axis=0))
    prods = jnp.sum(s * d, axis=1)
    return prods if as_logits else jax.nn.sigmoid(prods)


if __name__ == "__main__":
    key = jax.random.PRNGKey(0)

    def make_case(k, N, D, E, scale=1.0):
        k_tab, k_src, k_dst = jax.random.split(k, 3)
        tab = scale * jax.random.normal(k_tab, (N, D), dtype=jnp.float32)
        eds = jnp.stack(
            [jax.random.randint(k_src, (E,), 0, N, dtype=jnp.int32),
             jax.random.randint(k_dst, (E,), 0, N, dtype=jnp.int32)], axis=1)
        return tab, eds

    k1, k2, k3 = jax.random.split(key, 3)

    # Case 1: dimension=16, E spans two auto-sized blocks (fused one-hot path).
    table, edges = make_case(k1, N=64, D=16, E=300)
    probs = jax.block_until_ready(dot_product_decoder_forward(table, edges))
    logits = jax.block_until_ready(
        dot_product_decoder_forward(table, edges, as_logits=True, block_e=128))
    np.testing.assert_allclose(
        np.asarray(probs), np.asarray(_reference_forward(table, edges)),
        rtol=1e-5, atol=1e-5)
    np.testing.assert_allclose(
        np.asarray(logits),
        np.asarray(_reference_forward(table, edges, as_logits=True)),
        rtol=1e-5, atol=1e-5)

    # Case 2: the module's default dimension=1 (fused path, single block).
    table1, edges1 = make_case(k2, N=32, D=1, E=100, scale=2.0)
    probs1 = jax.block_until_ready(dot_product_decoder_forward(table1, edges1))
    np.testing.assert_allclose(
        np.asarray(probs1), np.asarray(_reference_forward(table1, edges1)),
        rtol=1e-5, atol=1e-5)

    # Case 3: table above the fused-gate threshold -> fallback path
    # (renorm kernel + XLA gather + lane-dense dot kernel), index-only padding.
    table2, edges2 = make_case(k3, N=1536, D=8, E=400)
    probs2 = jax.block_until_ready(dot_product_decoder_forward(table2, edges2))
    np.testing.assert_allclose(
        np.asarray(probs2), np.asarray(_reference_forward(table2, edges2)),
        rtol=1e-5, atol=1e-5)

    print("KERNEL_OK")
</pallas_src>

<mosaic_0001>
module attributes {stable_mosaic.version = 11 : i64} {
  func.func @_fused_decoder_kernel(%arg0: i32, %arg1: memref<1x256xi32, #tpu.memory_space<vmem>>, %arg2: memref<1x256xi32, #tpu.memory_space<vmem>>, %arg3: memref<16x64xf32, #tpu.memory_space<vmem>>, %arg4: memref<1x256xf32, #tpu.memory_space<vmem>>) attributes {dimension_semantics = [#tpu.dimension_semantics<parallel>], iteration_bounds = array<i64: 2>, scalar_prefetch = 0 : i64, scratch_operands = 0 : i64, tpu.core_type = #tpu.core_type<tc>, window_params = [{transform_indices = @transform_0, window_bounds = array<i64: 1, 256>}, {transform_indices = @transform_1, window_bounds = array<i64: 1, 256>}, {pipeline_mode = #tpu.pipeline_mode<synchronous>, transform_indices = @transform_2, window_bounds = array<i64: 16, 64>}, {transform_indices = @transform_3, window_bounds = array<i64: 1, 256>}]} {
    %c0 = arith.constant 0 : index
    %c0_0 = arith.constant 0 : index
    %0 = vector.load %arg3[%c0, %c0_0] : memref<16x64xf32, #tpu.memory_space<vmem>>, vector<16x64xf32>
    %1 = arith.mulf %0, %0 : vector<16x64xf32>
    %cst = arith.constant dense<0.000000e+00> : vector<64xf32>
    %2 = vector.multi_reduction <add>, %1, %cst [0] : vector<16x64xf32> to vector<64xf32>
    %3 = vector.shape_cast %2 : vector<64xf32> to vector<1x64xf32>
    %4 = math.sqrt %3 : vector<1x64xf32>
    %cst_1 = arith.constant 1.000000e+00 : f32
    %5 = vector.broadcast %cst_1 : f32 to vector<1x64xf32>
    %6 = arith.cmpf ogt, %4, %5 : vector<1x64xf32>
    %cst_2 = arith.constant 1.000000e-07 : f32
    %7 = vector.broadcast %cst_2 : f32 to vector<1x64xf32>
    %8 = arith.addf %4, %7 : vector<1x64xf32>
    %cst_3 = arith.constant 1.000000e+00 : f32
    %9 = vector.broadcast %cst_3 : f32 to vector<1x64xf32>
    %10 = arith.divf %9, %8 : vector<1x64xf32>
    %cst_4 = arith.constant 1.000000e+00 : f32
    %11 = vector.broadcast %cst_4 : f32 to vector<1x64xf32>
    %12 = arith.select %6, %10, %11 : vector<1x64xi1>, vector<1x64xf32>
    %13 = vector.broadcast %12 : vector<1x64xf32> to vector<16x64xf32>
    %14 = arith.mulf %0, %13 : vector<16x64xf32>
    %c0_5 = arith.constant 0 : index
    %c0_6 = arith.constant 0 : index
    %15 = vector.load %arg1[%c0_5, %c0_6] : memref<1x256xi32, #tpu.memory_space<vmem>>, vector<1x256xi32>
    %c0_7 = arith.constant 0 : index
    %c0_8 = arith.constant 0 : index
    %16 = vector.load %arg2[%c0_7, %c0_8] : memref<1x256xi32, #tpu.memory_space<vmem>>, vector<1x256xi32>
    %17 = tpu.iota {dimensions = array<i32: 0>} : vector<64x256xi32>
    %18 = vector.broadcast %15 : vector<1x256xi32> to vector<64x256xi32>
    %19 = arith.cmpi eq, %17, %18 : vector<64x256xi32>
    %20 = arith.extui %19 : vector<64x256xi1> to vector<64x256xi32>
    %21 = arith.sitofp %20 : vector<64x256xi32> to vector<64x256xf32>
    %22 = vector.broadcast %16 : vector<1x256xi32> to vector<64x256xi32>
    %23 = arith.cmpi eq, %17, %22 : vector<64x256xi32>
    %24 = arith.extui %23 : vector<64x256xi1> to vector<64x256xi32>
    %25 = arith.sitofp %24 : vector<64x256xi32> to vector<64x256xf32>
    %cst_9 = arith.constant dense<0.000000e+00> : vector<16x256xf32>
    %26 = tpu.matmul %14, %21, %cst_9 {dimension_numbers = #tpu.dot_dimension_numbers<[1], [0], [0], [1], [0, 0, 1, 1], [], []>, precision = #tpu.contract_precision<fp32>} : vector<16x64xf32>, vector<64x256xf32>, vector<16x256xf32> -> vector<16x256xf32>
    %cst_10 = arith.constant dense<0.000000e+00> : vector<16x256xf32>
    %27 = tpu.matmul %14, %25, %cst_10 {dimension_numbers = #tpu.dot_dimension_numbers<[1], [0], [0], [1], [0, 0, 1, 1], [], []>, precision = #tpu.contract_precision<fp32>} : vector<16x64xf32>, vector<64x256xf32>, vector<16x256xf32> -> vector<16x256xf32>
    %28 = arith.mulf %26, %27 : vector<16x256xf32>
    %cst_11 = arith.constant dense<0.000000e+00> : vector<256xf32>
    %29 = vector.multi_reduction <add>, %28, %cst_11 [0] : vector<16x256xf32> to vector<256xf32>
    %30 = vector.shape_cast %29 : vector<256xf32> to vector<1x256xf32>
    %31 = arith.negf %30 : vector<1x256xf32>
    %32 = math.exp %31 : vector<1x256xf32>
    %cst_12 = arith.constant 1.000000e+00 : f32
    %33 = vector.broadcast %cst_12 : f32 to vector<1x256xf32>
    %34 = arith.addf %33, %32 : vector<1x256xf32>
    %35 = arith.divf %33, %34 : vector<1x256xf32>
    %c0_13 = arith.constant 0 : index
    %c0_14 = arith.constant 0 : index
    %36 = vector.load %arg4[%c0_13, %c0_14] : memref<1x256xf32, #tpu.memory_space<vmem>>, vector<1x256xf32>
    tpu.vector_store %arg4[%c0_13, %c0_14], %35 {strides = array<i32>} : memref<1x256xf32, #tpu.memory_space<vmem>>, vector<1x256xf32>,
    return
  }
  func.func @transform_0(%arg0: i32) -> (i32, i32) {
    %c0_i32 = arith.constant 0 : i32
    %c0_i32_0 = arith.constant 0 : i32
    return %c0_i32, %arg0 : i32, i32
  }
  func.func @transform_1(%arg0: i32) -> (i32, i32) {
    %c0_i32 = arith.constant 0 : i32
    %c0_i32_0 = arith.constant 0 : i32
    return %c0_i32, %arg0 : i32, i32
  }
  func.func @transform_2(%arg0: i32) -> (i32, i32) {
    %c0_i32 = arith.constant 0 : i32
    %c0_i32_0 = arith.constant 0 : i32
    %c0_i32_1 = arith.constant 0 : i32
    return %c0_i32, %c0_i32_0 : i32, i32
  }
  func.func @transform_3(%arg0: i32) -> (i32, i32) {
    %c0_i32 = arith.constant 0 : i32
    %c0_i32_0 = arith.constant 0 : i32
    return %c0_i32, %arg0 : i32, i32
  }
}

</mosaic_0001>

<bundles_post_ra>
// kernel: tpu_custom_call.1
= control target key start
LH: loop header
LB: loop body
LE: loop exit
PB: predicated region body
PF: predicated region fallthrough
CT: control target
= control target key end

     0   :  { %8 = vsyncpa [#allocation3], 0  ;;  %s3715_s0 = inlined_call_operand.hbm [shape: s32[1,512], index: 0, kind: input, shape index: {}]   ;;  %s3716_s1 = inlined_call_operand.hbm [shape: s32[1,512], index: 1, kind: input, shape index: {}]   ;;  %s3717_s2 = inlined_call_operand.hbm [shape: f32[16,64], index: 2, kind: input, shape index: {}]   ;;  %s3718_s3 = inlined_call_operand.hbm [shape: f32[1,512], index: 3, kind: output, shape index: {}]  }
   0x1   :  { %10 = vsyncpa [#allocation3 + $0x1], 0 }
   0x2   :  { %11 = vsyncpa [#allocation6], 0 }
   0x3   :  { %13 = vsyncpa [#allocation6 + $0x1], 0 }
   0x4   :  { %14 = vsyncpa [#allocation4], 0 }
   0x5   :  { %16 = vsyncpa [#allocation4 + $0x1], 0  ;;  %s2618_s12 = smov 0   ;;  %s2620_s13 = smov 0  }
   0x6   :  { %s2622_s14 = smov 0   ;;  %s2624_s15 = smov 0  }
   0x7 LB: > { %s2639_s16 = sadd.s32 4294967295, %s2587_s15   ;;  %s1961_s17 = sadd.s32 4294967294, %s2587_s15   ;;  %s2587_s15 = sphi %s2624_s15, %s3968_s15   ;;  %s2583_s14 = sphi %s2622_s14, %s3967_s14   ;;  %s2579_s13 = sphi %s2620_s13, %s3966_s13   ;;  %s2575_s12 = sphi %s2618_s12, %s3965_s12  }
   0x8   : > { %p42_p0 = scmp.ne.s32.totalorder %s2579_s13, %s2575_s12  ;;  %p3719_p1 = scmp.eq.s32.totalorder %s2639_s16, 0 }
   0x9   : > { %p119_p3 = scmp.eq.s32.totalorder %s1961_s17, 1  ;;  %p1962_p5 = scmp.ge.s32.totalorder %s2587_s15, 1 }
   0xa   : > { %p2648_p4 = por %p3719_p1, %p42_p0  ;;  %p126_p7 = scmp.lt.s32.totalorder %s2587_s15, 3 }
   0xb   : > { %p2653_p6 = por %p119_p3, %p42_p0  ;;  %s2589_s21 = smov [#allocation7]  }
   0xc   : > { %s3786_s18 = scalar_select %p2648_p4, 1, 0 }
   0xd   : > { %s3787_s19 = scalar_select %p2653_p6, 1, 0 }
   0xe   : > { %p2658_p8 = pnand %p1962_p5, %p126_p7  ;;  %s138_s22 = sshll.u32 %s2589_s21, 4  ;;  %s2662_s22 = int_to_ptr.vmem [resolvable:$true] %s138_s22 }
   0xf   : > { %s2674_s24 = sadd.s32 1, %s2587_s15   ;;  %s29_s25 = sadd.s32 1, %s2583_s14 }
  0x10   : > { %s3788_s20 = scalar_select %p2658_p8, 1, 0 }
  0x11   : > { %p2356_p9 = pneg %p2658_p8  ;;  %s26_s26 = ssub.s32 %s2587_s15, %s2674_s24 }
  0x12   : > { %s2425_s29 = scalar_lea.hbm %s3717_s2, 256 }
  0x13   : > { %p2669_p11 = pnand %p2356_p9, %p3719_p1  ;;  %p2426_p12 = scmp.ne.s32.totalorder %s3717_s2, %s2425_s29 }
  0x14   : > { %p2432_p5 = scmp.lt.u32.totalorder %s2425_s29, %s3717_s2 }
  0x15   : > { %p2427_p13 = pneg %p2669_p11 }
  0x17   : > { %p2428_p0 = pnand %p2427_p13, %p2426_p12 }
  0x19   : > { %p2429_p3 = pneg %p2428_p0 }
  0x1b   : > { %p2434_p7 = pnand %p2432_p5, %p2429_p3 }
  0x1d   : > { %2437 = shalt.err (!%p2434_p7)
}
  0x1e   : > { %s2438_s7 = scalar_lea.vmem %s2662_s22, 256  ;;  %p2446_p2 = scmp.lt.s32.totalorder %s2662_s22, %s2662_s22 }
  0x1f   : > { %p2439_p9 = scmp.ne.s32.totalorder %s2662_s22, %s2438_s7  ;;  %p2447_p6 = scmp.lt.s32.totalorder %s2438_s7, %s2438_s7 }
  0x21   : > { %p2441_p10 = pnand %p2439_p9, %p2427_p13  ;;  %p2448_p4 = por %p2447_p6, %p2446_p2 }
  0x23   : > { %p2442_p1 = pneg %p2441_p10 }
  0x25   : > { %p2449_p8 = pnand %p2448_p4, %p2442_p1 }
  0x27   : > { %2452 = shalt.err (!%p2449_p8)
}
  0x28   : > { %s2590_s8 = smov 128   ;;  %s2591_s9 = smov 8  }
  0x29   : > { %2359 = dma.hbm_to_vmem [thread:$0]  (!%p2669_p11), %s3717_s2, 256, %s2662_s22, [#allocation6], %s2590_s8, %s2590_s8, %s2591_s9  }
  0x2a   : > { %p27_p2 = scmp.eq.s32.totalorder %s26_s26, 0  ;;  %p36_p1 = scmp.ne.s32.totalorder %s2583_s14, %s2579_s13 }
  0x2b   : > { %p37_p4 = scmp.eq.s32.totalorder %s2587_s15, 0  ;;  %p2372_p6 = scmp.lt.s32.totalorder %s2587_s15, 2 }
  0x2c   : > { %s2705_s17 = scalar_select %p27_p2, %s2583_s14, %s29_s25  }
  0x2d   : > { %p38_p8 = por %p37_p4, %p36_p1  ;;  %p3790_p10 = scmp.eq.s32.totalorder %s2639_s16, 1 }
  0x2e   : > { %s152_s27 = sand.u32 1, %s2583_s14   ;;  %s2111_s28 = sshll.u32 %s2587_s15, 5 }
  0x2f   : > { %p2709_p12 = por %p3790_p10, %p36_p1  ;;  %s2715_s29 = sshll.u32 %s152_s27, 1 }
  0x30   : > { %s2720_s22 = scalar_lea.hbm %s3715_s0, %s2111_s28  ;;  %s156_s25 = scalar_lea.vmem [#allocation2], %s2715_s29 }
  0x31   : > { %s3791_s21 = scalar_select %p2709_p12, 1, 0 }
  0x32   : > { %s164_s26 = sshll.u32 %s156_s25, 4  ;;  %p2723_p11 = pnand %p2372_p6, %p38_p8  ;;  %s2727_s26 = int_to_ptr.vmem [resolvable:$true] %s164_s26 }
  0x33   : > { %s2732_s7 = scalar_lea.hbm %s3716_s1, %s2111_s28  ;;  %s153_s8 = scalar_lea.sflag [#allocation3], %s152_s27 }
  0x34   : > { %s2453_s9 = scalar_lea.hbm %s2720_s22, 32  ;;  %p2455_p0 = pneg %p2723_p11 }
  0x35   : > { %p2454_p13 = scmp.ne.s32.totalorder %s2720_s22, %s2453_s9  ;;  %s2458_s23 = scalar_lea.hbm %s3715_s0, 64 }
  0x36   : > { %p2459_p7 = scmp.lt.u32.totalorder %s2720_s22, %s3715_s0  ;;  %p2460_p9 = scmp.lt.u32.totalorder %s2458_s23, %s2453_s9 }
  0x37   : > { %p2456_p3 = pnand %p2455_p0, %p2454_p13  ;;  %p2462_p1 = scmp.lt.u32.totalorder %s2453_s9, %s2720_s22 }
  0x38   : > { %p2461_p2 = por %p2460_p9, %p2459_p7 }
  0x39   : > { %p2457_p5 = pneg %p2456_p3 }
  0x3a   : > { %p2463_p4 = por %p2462_p1, %p2461_p2 }
  0x3c   : > { %p2464_p6 = pnand %p2463_p4, %p2457_p5 }
  0x3e   : > { %2467 = shalt.err (!%p2464_p6)
}
  0x3f   : > { %s2468_s27 = scalar_lea.vmem %s2727_s26, 32  ;;  %s2592_s28 = smov [#allocation2]  }
  0x40   : > { %p2469_p8 = scmp.ne.s32.totalorder %s2727_s26, %s2468_s27  ;;  %s2473_s5 = sshll.u32 %s2592_s28, 4  ;;  %s2474_s5 = int_to_ptr.vmem [resolvable:$false] %s2473_s5 }
  0x41   : > { %s2475_s6 = scalar_lea.vmem %s2474_s5, 64  ;;  %p2476_p3 = scmp.lt.s32.totalorder %s2727_s26, %s2474_s5 }
  0x42   : > { %p2471_p10 = pnand %p2469_p8, %p2455_p0  ;;  %p2477_p7 = scmp.lt.s32.totalorder %s2475_s6, %s2468_s27 }
  0x44   : > { %p2472_p13 = pneg %p2471_p10  ;;  %p2478_p9 = por %p2477_p7, %p2476_p3 }
  0x46   : > { %p2479_p2 = pnand %p2478_p9, %p2472_p13 }
  0x48   : > { %2482 = shalt.err (!%p2479_p2)
}
  0x49   : > { %2363 = dma.hbm_to_vmem [thread:$0]  (!%p2723_p11), %s2720_s22, 32, %s2727_s26, %s153_s8  }
  0x4a   : > { %s171_s9 = sand.u32 1, %s2587_s15   ;;  %s175_s10 = scalar_lea.vmem [#allocation5], %s2715_s29 }
  0x4b   : > { %s183_s11 = sshll.u32 %s175_s10, 4  ;;  %s172_s23 = scalar_lea.sflag [#allocation6], %s171_s9  ;;  %s184_s11 = int_to_ptr.vmem [resolvable:$true] %s183_s11 }
  0x4c   : > { %s2483_s30 = scalar_lea.hbm %s2732_s7, 32  ;;  %s2488_s28 = scalar_lea.hbm %s3716_s1, 64 }
  0x4d   : > { %p2484_p5 = scmp.ne.s32.totalorder %s2732_s7, %s2483_s30  ;;  %p2489_p6 = scmp.lt.u32.totalorder %s2732_s7, %s3716_s1 }
  0x4e   : > { %p2490_p8 = scmp.lt.u32.totalorder %s2488_s28, %s2483_s30  ;;  %p2492_p13 = scmp.lt.u32.totalorder %s2483_s30, %s2732_s7 }
  0x4f   : > { %p2486_p1 = pnand %p2484_p5, %p2455_p0 }
  0x50   : > { %p2491_p10 = por %p2490_p8, %p2489_p6 }
  0x51   : > { %p2487_p4 = pneg %p2486_p1 }
  0x52   : > { %p2493_p3 = por %p2492_p13, %p2491_p10 }
  0x54   : > { %p2494_p7 = pnand %p2493_p3, %p2487_p4 }
  0x56   : > { %2497 = shalt.err (!%p2494_p7)
}
  0x57   : > { %s2498_s29 = scalar_lea.vmem %s184_s11, 32  ;;  %s2593_s22 = smov [#allocation5]  }
  0x58   : > { %p2499_p9 = scmp.ne.s32.totalorder %s184_s11, %s2498_s29  ;;  %s2503_s26 = sshll.u32 %s2593_s22, 4  ;;  %s2504_s26 = int_to_ptr.vmem [resolvable:$false] %s2503_s26 }
  0x59   : > { %s2505_s8 = scalar_lea.vmem %s2504_s26, 64  ;;  %p2506_p1 = scmp.lt.s32.totalorder %s184_s11, %s2504_s26 }
  0x5a   : > { %p2501_p2 = pnand %p2499_p9, %p2455_p0  ;;  %p2507_p12 = scmp.lt.s32.totalorder %s2505_s8, %s2498_s29 }
  0x5c   : > { %p2502_p5 = pneg %p2501_p2  ;;  %p2508_p6 = por %p2507_p12, %p2506_p1 }
  0x5e   : > { %p2509_p8 = pnand %p2508_p6, %p2502_p5 }
  0x60   : > { %2512 = shalt.err (!%p2509_p8)
}
  0x61   : > { %2366 = dma.hbm_to_vmem [thread:$0]  (!%p2723_p11), %s2732_s7, 32, %s184_s11, %s172_s23  }
  0x62   : > { %p3793_p4 = scmp.ne.s32.totalorder %s3788_s20, 0 }
  0x64   : > { %192 = sbr.rel (%p3793_p4) target bundleno = 582 (0x246), region = 32 }
  0x6b   : > { %s2783_s9 = sand.u32 1, %s2579_s13   ;;  %p3794_p12 = scmp.ne.s32.totalorder %s3786_s18, 0 }
  0x6c   : > { %s2786_s10 = sshll.u32 %s2783_s9, 1  ;;  %s195_s30 = scalar_lea.sflag [#allocation3], %s2783_s9 }
  0x6d   : > { %s198_s25 = scalar_lea.vmem [#allocation2], %s2786_s10 }
  0x6e   : > { %2558 = dma.done.wait (%p3794_p12), %s195_s30, 32  }
  0x6f   : > { %2560 = vsyncadd (%p3794_p12), %s195_s30, 4294967264  ;;  %s203_s20 = sand.u32 1, %s2639_s16   ;;  %s207_s7 = scalar_lea.vmem [#allocation5], %s2786_s10 }
  0x70   : > { %s204_s4 = scalar_lea.sflag [#allocation6], %s203_s20 }
  0x71   : > { %2562 = dma.done.wait (%p3794_p12), %s204_s4, 32  }
  0x72   : > { %2564 = vsyncadd (%p3794_p12), %s204_s4, 4294967264  ;;  %p3795_p11 = scmp.eq.s32.totalorder %s2639_s16, 0 }
  0x74   : > { %2566 = dma.done.wait (%p3795_p11), [#allocation6], 256   ;;  %p3796_p0 = pmov %p3795_p11 }
  0x75   : > { %v3723_v0 = vlaneseq  ;;  %v3736_v1 = vmov 0.0   ;;  %v270_v8 = vld [vmem:[%s198_s25] sm:$0x3]  ;;  %v271_v9 = vld [vmem:[%s207_s7] sm:$0x3]  ;;  %v2821_v11 = vld [vmem:[#allocation7] sm:$0xff] }
  0x76   : > { %2568 = vsyncadd (%p3796_p0), [#allocation6], 4294967040  ;;  %479 = vmatprep.mubr.f32.mxu0 %v3736_v1  ;;  %1175 = vmatprep.mubr.f32.mxu1 %v3736_v1  ;;  %v2833_v16 = vld [vmem:[#allocation7 + $0x8] sm:$0xff]  ;;  %v2844_v20 = vmul.f32 %v2821_v11, %v2821_v11  ;;  %v3798_v23 = vmov 0  ;;  %v3741_v26 = vmov 1.0|1.0  }
  0x77   : > { %v2807_v2 = vshrl.u32 %v3723_v0, 7  ;;  %v2861_v25 = vmul.f32 %v2833_v16, %v2833_v16  ;;  %v3801_v30 = vmov 0  ;;  %v3804_v34 = vmov 0  ;;  %s2113_s18 = sshll.u32 %s2639_s16, 5  ;;  %s238_s11 = scalar_lea.vmem [#allocation8], %s2786_s10 }
  0x78   : > { %v3807_v39 = vmov 0  ;;  %v3810_v46 = vmov 0  ;;  %v3813_v51 = vmov 0  ;;  %s1859_s23 = sshll.u32 %s238_s11, 4  ;;  %s3671_s5 = scalar_lea.hbm %s3718_s3, %s2113_s18  ;;  %s3673_s23 = int_to_ptr.vmem [resolvable:$true] %s1859_s23 }
  0x79   : > { %3797 = vst [vmem:[#allocation13_spill] sm:$0xff] %v2807_v2  ;;  %v287_v3 = vsub.s32 1, %v2807_v2  ;;  %v283_v4 = vsub.s32 0, %v2807_v2  ;;  %v274_v5 = vadd.s32 8, %v2807_v2  ;;  %v2813_v6 = vadd.s32 16, %v2807_v2  ;;  %s1845_s6 = scalar_lea.sflag [#allocation4], %s2783_s9 }
  0x7a   : > { %v2816_v7 = vadd.s32 24, %v2807_v2  ;;  %v2819_v10 = vadd.s32 32, %v2807_v2  ;;  %v2828_v14 = vadd.s32 40, %v2807_v2  ;;  %v2831_v15 = vadd.s32 48, %v2807_v2  ;;  %s2513_s29 = scalar_lea.vmem %s3673_s23, 32  ;;  %p3962_p13 = scmp.ne.s32.totalorder %s3791_s21, 0 }
  0x7b   : > { %v2823_v12 = vrot.slane %v270_v8, %v287_v3  ;;  %v2825_v13 = vrot.slane %v271_v9, %v287_v3  ;;  %v2835_v17 = vrot.slane %v270_v8, %v283_v4  ;;  %v2837_v18 = vrot.slane %v271_v9, %v283_v4  ;;  %p2514_p10 = scmp.ne.s32.totalorder %s3673_s23, %s2513_s29  ;;  %s2597_s16 = smov [#allocation8]  }
  0x7c   : > { %v2840_v19 = vadd.s32 56, %v2807_v2  ;;  %s2517_s22 = sshll.u32 %s2597_s16, 4  ;;  %s2518_s22 = int_to_ptr.vmem [resolvable:$false] %s2517_s22 }
  0x7d   : > { %vm290_vm0 = vcmp.eq.s32.totalorder %v2807_v2, %v2823_v12  ;;  %vm292_vm1 = vcmp.eq.s32.totalorder %v274_v5, %v2823_v12  ;;  %vm346_vm2 = vcmp.eq.s32.totalorder %v2807_v2, %v2825_v13  ;;  %vm348_vm3 = vcmp.eq.s32.totalorder %v274_v5, %v2825_v13  ;;  %p2515_p3 = pnand %p2514_p10, %p3962_p13  ;;  %s2519_s26 = scalar_lea.vmem %s2518_s22, 64 }
  0x7e   : > { %v1977_v21 = vsel %vm290_vm0, 1.0, %v3736_v1  ;;  %v1979_v22 = vsel %vm292_vm1, 1.0, %v3736_v1  ;;  %vm2854_vm4 = vmpackc.low %vm292_vm1, %vm290_vm0  ;;  %v1993_v24 = vsel %vm346_vm2, 1.0, %v3736_v1  ;;  %v1995_v29 = vsel %vm348_vm3, 1.0, %v3736_v1  ;;  %p2520_p9 = scmp.lt.s32.totalorder %s3673_s23, %s2518_s22  ;;  %p2521_p2 = scmp.lt.s32.totalorder %s2519_s26, %s2513_s29 }
  0x7f   : > { %v3799_v23 = vsel %vm2854_vm4, 4294967295, %v3798_v23  ;;  %2115 = vmatprep.subr.msk.bf16.mxu0 %vm2854_vm4, %v3741_v26  ;;  %v2866_v27 = vsub.f32 %v1977_v21, %v1977_v21  ;;  %v2868_v28 = vsub.f32 %v1979_v22, %v1979_v22  ;;  %vm2871_vm5 = vmpackc.low %vm348_vm3, %vm346_vm2  ;;  %v2875_v31 = vsub.f32 %v1993_v24, %v1993_v24  ;;  %p2516_p7 = pneg %p2515_p3 }
  0x80   : > { %3800 = vst [vmem:[#allocation14_spill] sm:$0xff] %v3799_v23  ;;  %v3802_v30 = vsel %vm2871_vm5, 4294967295, %v3801_v30  ;;  %2211 = vmatprep.subr.msk.bf16.mxu1 %vm2871_vm5, %v3741_v26  ;;  %vm289_vm6 = vcmp.eq.s32.totalorder %v2807_v2, %v2835_v17  ;;  %vm291_vm7 = vcmp.eq.s32.totalorder %v274_v5, %v2835_v17  ;;  %vm345_vm8 = vcmp.eq.s32.totalorder %v2807_v2, %v2837_v18  ;;  %p2522_p5 = por %p2521_p2, %p2520_p9 }
  0x81   : > { %3803 = vst [vmem:[#allocation15_spill] sm:$0xff] %v3802_v30  ;;  %vm347_vm9 = vcmp.eq.s32.totalorder %v274_v5, %v2837_v18  ;;  %v1976_v32 = vsel %vm289_vm6, 1.0, %v3736_v1  ;;  %v1978_v33 = vsel %vm291_vm7, 1.0, %v3736_v1  ;;  %vm2888_vm10 = vmpackc.low %vm291_vm7, %vm289_vm6  ;;  %v1992_v35 = vsel %vm345_vm8, 1.0, %v3736_v1 }
  0x82   : > { %v3805_v34 = vsel %vm2888_vm10, 4294967295, %v3804_v34  ;;  %v1994_v36 = vsel %vm347_vm9, 1.0, %v3736_v1  ;;  %2117 = vmatpush1.bf16.msk.msra.mxu0 %vm2888_vm10, %v3741_v26  ;;  %v2897_v37 = vsub.f32 %v1976_v32, %v1976_v32  ;;  %v2899_v38 = vsub.f32 %v1978_v33, %v1978_v33  ;;  %vm2901_vm11 = vmpackc.low %vm347_vm9, %vm345_vm8  ;;  %p2523_p1 = pnand %p2522_p5, %p2516_p7 }
  0x83   : > { %3806 = vst [vmem:[#allocation16_spill] sm:$0xff] %v3805_v34  ;;  %v3808_v39 = vsel %vm2901_vm11, 4294967295, %v3807_v39  ;;  %v2905_v40 = vsub.f32 %v1992_v35, %v1992_v35  ;;  %v2907_v41 = vsub.f32 %v1994_v36, %v1994_v36  ;;  %2213 = vmatpush1.bf16.msk.msra.mxu1 %vm2901_vm11, %v3741_v26  ;;  %vm294_vm12 = vcmp.eq.s32.totalorder %v2813_v6, %v2823_v12 }
  0x84   : > { %3809 = vst [vmem:[#allocation17_spill] sm:$0xff] %v3808_v39  ;;  %vm296_vm13 = vcmp.eq.s32.totalorder %v2816_v7, %v2823_v12  ;;  %vm350_vm14 = vcmp.eq.s32.totalorder %v2813_v6, %v2825_v13  ;;  %vm352_vm15 = vcmp.eq.s32.totalorder %v2816_v7, %v2825_v13  ;;  %v3727_v42 = vand.u32 4294901760, %v2897_v37 }
  0x85   : > { %v3726_v43 = vand.u32 4294901760, %v2899_v38  ;;  %v3725_v44 = vand.u32 4294901760, %v2905_v40  ;;  %v3724_v45 = vand.u32 4294901760, %v2907_v41  ;;  %vm2924_vm0 = vmpackc.low %vm296_vm13, %vm294_vm12  ;;  %v1981_v47 = vsel %vm294_vm12, 1.0, %v3736_v1 }
  0x86   : > { %v3811_v46 = vsel %vm2924_vm0, 4294967295, %v3810_v46  ;;  %v1983_v48 = vsel %vm296_vm13, 1.0, %v3736_v1  ;;  %2119 = vmatprep.subr.msk.bf16.mxu0 %vm2924_vm0, %v3741_v26  ;;  %v1997_v49 = vsel %vm350_vm14, 1.0, %v3736_v1  ;;  %v1999_v50 = vsel %vm352_vm15, 1.0, %v3736_v1  ;;  %vm2935_vm1 = vmpackc.low %vm352_vm15, %vm350_vm14 }
  0x87   : > { %3812 = vst [vmem:[#allocation18_spill] sm:$0xff] %v3811_v46  ;;  %v3814_v51 = vsel %vm2935_vm1, 4294967295, %v3813_v51  ;;  %v2939_v52 = vsub.f32 %v1995_v29, %v1995_v29  ;;  %v2944_v53 = vsub.f32 %v2897_v37, %v3727_v42  ;;  %v2949_v54 = vsub.f32 %v2899_v38, %v3726_v43  ;;  %2215 = vmatprep.subr.msk.bf16.mxu1 %vm2935_vm1, %v3741_v26 }
  0x88   : > { %3815 = vst [vmem:[#allocation19_spill] sm:$0xff] %v3814_v51  ;;  %v2954_v55 = vsub.f32 %v2905_v40, %v3725_v44  ;;  %v2962_v56 = vsub.f32 %v2907_v41, %v3724_v45  ;;  %v2964_v57 = vsub.f32 %v1981_v47, %v1981_v47  ;;  %v2966_v58 = vsub.f32 %v1983_v48, %v1983_v48 }
  0x89   : > { %v2968_v59 = vsub.f32 %v1997_v49, %v1997_v49  ;;  %v2973_v63 = vsub.f32 %v1999_v50, %v1999_v50  ;;  %vm293_vm2 = vcmp.eq.s32.totalorder %v2813_v6, %v2835_v17  ;;  %vm295_vm3 = vcmp.eq.s32.totalorder %v2816_v7, %v2835_v17 }
  0x8a   : > { %vm349_vm6 = vcmp.eq.s32.totalorder %v2813_v6, %v2837_v18  ;;  %vm351_vm7 = vcmp.eq.s32.totalorder %v2816_v7, %v2837_v18  ;;  %v1980_v3 = vsel %vm293_vm2, 1.0, %v3736_v1  ;;  %v1982_v4 = vsel %vm295_vm3, 1.0, %v3736_v1  ;;  %vm2985_vm8 = vmpackc.low %vm295_vm3, %vm293_vm2 }
  0x8b   : > { %v3816_v5 = vmov 0  ;;  %v1996_v8 = vsel %vm349_vm6, 1.0, %v3736_v1  ;;  %v1998_v9 = vsel %vm351_vm7, 1.0, %v3736_v1  ;;  %2121 = vmatpush1.bf16.msk.msra.mxu0 %vm2985_vm8, %v3741_v26  ;;  %v2994_v6 = vsub.f32 %v1980_v3, %v1980_v3  ;;  %vm2998_vm9 = vmpackc.low %vm351_vm7, %vm349_vm6 }
  0x8c   : > { %v3817_v5 = vsel %vm2985_vm8, 4294967295, %v3816_v5  ;;  %v2996_v21 = vsub.f32 %v1982_v4, %v1982_v4  ;;  %v3819_v7 = vmov 0  ;;  %v3002_v22 = vsub.f32 %v1996_v8, %v1996_v8  ;;  %2217 = vmatpush1.bf16.msk.msra.mxu1 %vm2998_vm9, %v3741_v26 }
  0x8d   : > { %3818 = vst [vmem:[#allocation20_spill] sm:$0xff] %v3817_v5  ;;  %v3820_v7 = vsel %vm2998_vm9, 4294967295, %v3819_v7  ;;  %v3004_v24 = vsub.f32 %v1998_v9, %v1998_v9  ;;  %vm298_vm12 = vcmp.eq.s32.totalorder %v2819_v10, %v2823_v12  ;;  %vm300_vm13 = vcmp.eq.s32.totalorder %v2828_v14, %v2823_v12 }
  0x8e   : > { %3821 = vst [vmem:[#allocation21_spill] sm:$0xff] %v3820_v7  ;;  %vm354_vm14 = vcmp.eq.s32.totalorder %v2819_v10, %v2825_v13  ;;  %vm356_vm15 = vcmp.eq.s32.totalorder %v2828_v14, %v2825_v13  ;;  %vm3021_vm2 = vmpackc.low %vm300_vm13, %vm298_vm12  ;;  %v3822_v36 = vmov 0  ;;  %v1985_v48 = vsel %vm298_vm12, 1.0, %v3736_v1 }
  0x8f   : > { %v3823_v36 = vsel %vm3021_vm2, 4294967295, %v3822_v36  ;;  %v1987_v49 = vsel %vm300_vm13, 1.0, %v3736_v1  ;;  %2123 = vmatprep.subr.msk.bf16.mxu0 %vm3021_vm2, %v3741_v26  ;;  %v2001_v50 = vsel %vm354_vm14, 1.0, %v3736_v1  ;;  %vm3032_vm3 = vmpackc.low %vm356_vm15, %vm354_vm14  ;;  %v3825_v3 = vmov 0 }
  0x90   : > { %3824 = vst [vmem:[#allocation22_spill] sm:$0xff] %v3823_v36  ;;  %v3826_v3 = vsel %vm3032_vm3, 4294967295, %v3825_v3  ;;  %v3036_v4 = vsub.f32 %v1985_v48, %v1985_v48  ;;  %v3038_v8 = vsub.f32 %v1987_v49, %v1987_v49  ;;  %v2003_v9 = vsel %vm356_vm15, 1.0, %v3736_v1  ;;  %2219 = vmatprep.subr.msk.bf16.mxu1 %vm3032_vm3, %v3741_v26 }
  0x91   : > { %3827 = vst [vmem:[#allocation23_spill] sm:$0xff] %v3826_v3  ;;  %v3044_v0 = vsub.f32 %v2001_v50, %v2001_v50  ;;  %vm297_vm6 = vcmp.eq.s32.totalorder %v2819_v10, %v2835_v17  ;;  %vm299_vm7 = vcmp.eq.s32.totalorder %v2828_v14, %v2835_v17  ;;  %vm353_vm12 = vcmp.eq.s32.totalorder %v2819_v10, %v2837_v18 }
  0x92   : > { %vm355_vm13 = vcmp.eq.s32.totalorder %v2828_v14, %v2837_v18  ;;  %v1984_v48 = vsel %vm297_vm6, 1.0, %v3736_v1  ;;  %v1986_v49 = vsel %vm299_vm7, 1.0, %v3736_v1  ;;  %vm3056_vm14 = vmpackc.low %vm299_vm7, %vm297_vm6  ;;  %v3828_v45 = vmov 0 }
  0x93   : > { %v3829_v45 = vsel %vm3056_vm14, 4294967295, %v3828_v45  ;;  %v2000_v50 = vsel %vm353_vm12, 1.0, %v3736_v1  ;;  %v2002_v44 = vsel %vm355_vm13, 1.0, %v3736_v1  ;;  %2125 = vmatpush1.bf16.msk.msra.mxu0 %vm3056_vm14, %v3741_v26  ;;  %v3065_v10 = vsub.f32 %v1984_v48, %v1984_v48  ;;  %vm3069_vm15 = vmpackc.low %vm355_vm13, %vm353_vm12 }
  0x94   : > { %3830 = vst [vmem:[#allocation24_spill] sm:$0xff] %v3829_v45  ;;  %v3067_v43 = vsub.f32 %v1986_v49, %v1986_v49  ;;  %v3831_v14 = vmov 0  ;;  %v3073_v42 = vsub.f32 %v2000_v50, %v2000_v50  ;;  %v3075_v47 = vsub.f32 %v2002_v44, %v2002_v44  ;;  %2221 = vmatpush1.bf16.msk.msra.mxu1 %vm3069_vm15, %v3741_v26 }
  0x95   : > { %v3832_v14 = vsel %vm3069_vm15, 4294967295, %v3831_v14  ;;  %vm302_vm7 = vcmp.eq.s32.totalorder %v2831_v15, %v2823_v12  ;;  %vm304_vm14 = vcmp.eq.s32.totalorder %v2840_v19, %v2823_v12  ;;  %vm358_vm12 = vcmp.eq.s32.totalorder %v2831_v15, %v2825_v13 }
  0x96   : > { %3833 = vst [vmem:[#allocation25_spill] sm:$0xff] %v3832_v14  ;;  %vm360_vm13 = vcmp.eq.s32.totalorder %v2840_v19, %v2825_v13  ;;  %v3088_v48 = vsub.f32 %v2003_v9, %v2003_v9  ;;  %vm3093_vm6 = vmpackc.low %vm304_vm14, %vm302_vm7  ;;  %v3834_v35 = vmov 0  ;;  %v1989_v33 = vsel %vm302_vm7, 1.0, %v3736_v1 }
  0x97   : > { %v3835_v35 = vsel %vm3093_vm6, 4294967295, %v3834_v35  ;;  %v1991_v32 = vsel %vm304_vm14, 1.0, %v3736_v1  ;;  %2127 = vmatprep.subr.msk.bf16.mxu0 %vm3093_vm6, %v3741_v26  ;;  %v2005_v13 = vsel %vm358_vm12, 1.0, %v3736_v1  ;;  %vm3104_vm15 = vmpackc.low %vm360_vm13, %vm358_vm12  ;;  %v3837_v9 = vmov 0 }
  0x98   : > { %3836 = vst [vmem:[#allocation26_spill] sm:$0xff] %v3835_v35  ;;  %v3838_v9 = vsel %vm3104_vm15, 4294967295, %v3837_v9  ;;  %v3108_v50 = vsub.f32 %v1989_v33, %v1989_v33  ;;  %v3110_v49 = vsub.f32 %v1991_v32, %v1991_v32  ;;  %v2007_v12 = vsel %vm360_vm13, 1.0, %v3736_v1  ;;  %2223 = vmatprep.subr.msk.bf16.mxu1 %vm3104_vm15, %v3741_v26 }
  0x99   : > { %3839 = vst [vmem:[#allocation27_spill] sm:$0xff] %v3838_v9  ;;  %v3116_v44 = vsub.f32 %v2005_v13, %v2005_v13  ;;  %vm301_vm14 = vcmp.eq.s32.totalorder %v2831_v15, %v2835_v17  ;;  %vm303_vm7 = vcmp.eq.s32.totalorder %v2840_v19, %v2835_v17  ;;  %vm357_vm12 = vcmp.eq.s32.totalorder %v2831_v15, %v2837_v18 }
  0x9a   : > { %vm359_vm6 = vcmp.eq.s32.totalorder %v2840_v19, %v2837_v18  ;;  %v1988_v32 = vsel %vm301_vm14, 1.0, %v3736_v1  ;;  %v1990_v33 = vsel %vm303_vm7, 1.0, %v3736_v1  ;;  %vm3128_vm13 = vmpackc.low %vm303_vm7, %vm301_vm14  ;;  %v3840_v29 = vmov 0 }
  0x9b   : > { %v3841_v29 = vsel %vm3128_vm13, 4294967295, %v3840_v29  ;;  %v2004_v13 = vsel %vm357_vm12, 1.0, %v3736_v1  ;;  %v2006_v62 = vsel %vm359_vm6, 1.0, %v3736_v1  ;;  %v3134_v61 = vsub.f32 %v2007_v12, %v2007_v12  ;;  %2129 = vmatpush1.bf16.msk.msra.mxu0 %vm3128_vm13, %v3741_v26  ;;  %vm3143_vm15 = vmpackc.low %vm359_vm6, %vm357_vm12 }
  0x9c   : > { %3842 = vst [vmem:[#allocation28_spill] sm:$0xff] %v3841_v29  ;;  %v3139_v15 = vsub.f32 %v1988_v32, %v1988_v32  ;;  %v3141_v17 = vsub.f32 %v1990_v33, %v1990_v33  ;;  %v3843_v18 = vmov 0  ;;  %v3147_v19 = vsub.f32 %v2004_v13, %v2004_v13  ;;  %2225 = vmatpush1.bf16.msk.msra.mxu1 %vm3143_vm15, %v3741_v26 }
  0x9d   : > { %v3844_v18 = vsel %vm3143_vm15, 4294967295, %v3843_v18  ;;  %v3745_v12 = vand.u32 4294901760, %v2866_v27  ;;  %v3750_v1 = vand.u32 4294901760, %v2868_v28  ;;  %v3751_v60 = vand.u32 4294901760, %v2875_v31 }
  0x9e   : > { %3845 = vst [vmem:[#allocation29_spill] sm:$0xff] %v3844_v18  ;;  %v3159_v13 = vsub.f32 %v2006_v62, %v2006_v62  ;;  %v3846_v33 = vand.u32 4294901760, %v2939_v52  ;;  %vm3847_vm6 = vcmask 523264   ;;  %v3850_v9 = vand.u32 4294901760, %v2949_v54 }
  0x9f   : > { %v505_v26 = vsub.f32 %v2866_v27, %v3745_v12  ;;  %v517_v18 = vsub.f32 %v2868_v28, %v3750_v1  ;;  %v1201_v32 = vsub.f32 %v2875_v31, %v3751_v60  ;;  %v247_v62 = vsel %vm3847_vm6, %v2844_v20, 0.0  ;;  %vm3848_vm14 = vmmov %vm3847_vm6 }
  0xa0   : > { %v1213_v2 = vsub.f32 %v2939_v52, %v3846_v33  ;;  %v248_v29 = vsel %vm3848_vm14, %v2861_v25, 0.0  ;;  %v3849_v12 = vand.u32 4294901760, %v2944_v53  ;;  %v3851_v1 = vand.u32 4294901760, %v2954_v55 }
  0xa1   : > { %v3852_v60 = vand.u32 4294901760, %v2962_v56  ;;  %v506_v45 = vand.u32 4294901760, %v505_v26  ;;  %v518_v33 = vand.u32 4294901760, %v517_v18  ;;  %v1202_v3 = vand.u32 4294901760, %v1201_v32 }
  0xa2   : > { %v3181_v35 = vpack.c.bf16 %v3850_v9, %v3849_v12  ;;  %v1214_v36 = vand.u32 4294901760, %v1213_v2  ;;  %v249_v20 = vadd.f32 %v248_v29, %v247_v62  ;;  %v3764_v7 = vand.u32 4294901760, %v2964_v57 }
  0xa3   : > { %v3187_v14 = vpack.c.bf16 %v3852_v60, %v3851_v1  ;;  %v3762_v25 = vand.u32 4294901760, %v2966_v58  ;;  %v3763_v53 = vand.u32 4294901760, %v2968_v59  ;;  %v2130_v54 = vpack.c.bf16 %v518_v33, %v506_v45 }
  0xa4   : > { %v2226_v9 = vpack.c.bf16 %v1214_v36, %v1202_v3  ;;  %v3765_v12 = vand.u32 4294901760, %v2973_v63  ;;  %v3853_v55 = vand.u32 4294901760, %v2994_v6  ;;  %v250_v56 = vrot.slane %v249_v20, 4 }
  0xa5   : > { %v529_v2 = vsub.f32 %v2964_v57, %v3764_v7  ;;  %v541_v26 = vsub.f32 %v2966_v58, %v3762_v25  ;;  %v1225_v45 = vsub.f32 %v2968_v59, %v3763_v53  ;;  %2131 = vmatprep.subr.bf16.mxu0 %v2130_v54  ;;  %v3854_v36 = vand.u32 4294901760, %v2996_v21 }
  0xa6   : > { %v535_v1 = vsub.f32 %v2994_v6, %v3853_v55  ;;  %2227 = vmatprep.subr.bf16.mxu1 %v2226_v9  ;;  %v1237_v60 = vsub.f32 %v2973_v63, %v3765_v12  ;;  %v3855_v18 = vand.u32 4294901760, %v3002_v22  ;;  %v251_v62 = vadd.f32 %v250_v56, %v249_v20 }
  0xa7   : > { %v547_v3 = vsub.f32 %v2996_v21, %v3854_v36  ;;  %v530_v33 = vand.u32 4294901760, %v529_v2  ;;  %v542_v55 = vand.u32 4294901760, %v541_v26  ;;  %v1226_v25 = vand.u32 4294901760, %v1225_v45 }
  0xa8   : > { %v536_v29 = vand.u32 4294901760, %v535_v1  ;;  %v1231_v32 = vsub.f32 %v3002_v22, %v3855_v18  ;;  %v1238_v53 = vand.u32 4294901760, %v1237_v60  ;;  %v3856_v7 = vand.u32 4294901760, %v3004_v24 }
  0xa9   : > { %v548_v54 = vand.u32 4294901760, %v547_v3  ;;  %v252_v1 = vrot.slane %v251_v62, 2  ;;  %v3217_v5 = vpack.c.bf16 %v542_v55, %v530_v33  ;;  %v3774_v36 = vand.u32 4294901760, %v3036_v4 }
  0xaa   : > { %v1232_v9 = vand.u32 4294901760, %v1231_v32  ;;  %v1243_v12 = vsub.f32 %v3004_v24, %v3856_v7  ;;  %v3773_v51 = vand.u32 4294901760, %v3038_v8  ;;  %v3221_v46 = vpack.c.bf16 %v1238_v53, %v1226_v25 }
  0xab   : > { %v3223_v20 = vpack.c.bf16 %v548_v54, %v536_v29  ;;  %v3772_v2 = vand.u32 4294901760, %v3044_v0  ;;  %v253_v26 = vadd.f32 %v252_v1, %v251_v62  ;;  %v553_v45 = vsub.f32 %v3036_v4, %v3774_v36 }
  0xac   : > { %v1244_v56 = vand.u32 4294901760, %v1243_v12  ;;  %v565_v7 = vsub.f32 %v3038_v8, %v3773_v51  ;;  %v3779_v60 = vand.u32 4294901760, %v3088_v48  ;;  %v3857_v53 = vand.u32 4294901760, %v3065_v10 }
  0xad   : > { %v1249_v25 = vsub.f32 %v3044_v0, %v3772_v2  ;;  %v3858_v29 = vand.u32 4294901760, %v3067_v43  ;;  %v254_v32 = vrot.slane %v253_v26, 1  ;;  %v554_v62 = vand.u32 4294901760, %v553_v45 }
  0xae   : > { %v3233_v3 = vpack.c.bf16 %v1244_v56, %v1232_v9  ;;  %v559_v12 = vsub.f32 %v3065_v10, %v3857_v53  ;;  %v566_v33 = vand.u32 4294901760, %v565_v7  ;;  %v1261_v55 = vsub.f32 %v3088_v48, %v3779_v60 }
  0xaf   : > { %v571_v18 = vsub.f32 %v3067_v43, %v3858_v29  ;;  %v1250_v54 = vand.u32 4294901760, %v1249_v25  ;;  %v3859_v56 = vand.u32 4294901760, %v3073_v42  ;;  %v3250_v51 = vadd.f32 %v254_v32, %v253_v26 }
  0xb0   : > { %v560_v9 = vand.u32 4294901760, %v559_v12  ;;  %v3252_v53 = vpack.c.bf16 %v566_v33, %v554_v62  ;;  %v1262_v36 = vand.u32 4294901760, %v1261_v55  ;;  %v3860_v29 = vand.u32 4294901760, %v3075_v47 }
  0xb1   : > { %v572_v1 = vand.u32 4294901760, %v571_v18  ;;  %v1255_v2 = vsub.f32 %v3073_v42, %v3859_v56  ;;  %v3778_v25 = vand.u32 4294901760, %v3108_v50  ;;  %v3777_v12 = vand.u32 4294901760, %v3110_v49 }
  0xb2   : > { %v1267_v45 = vsub.f32 %v3075_v47, %v3860_v29  ;;  %2413 = vrsqrt.f32 %v3250_v51  ;;  %v261_v26 = vand.u32 2147483648, %v3250_v51  ;;  %v3264_v32 = vpack.c.bf16 %v1262_v36, %v1250_v54 }
  0xb3   : > { %v3257_v7 = vpack.c.bf16 %v572_v1, %v560_v9  ;;  %v1256_v39 = vand.u32 4294901760, %v1255_v2  ;;  %v577_v33 = vsub.f32 %v3108_v50, %v3778_v25  ;;  %v589_v2 = vsub.f32 %v3110_v49, %v3777_v12 }
  0xb4   : > { %3862 = vst [vmem:[#allocation31_spill] sm:$0xff] %v3264_v32  ;;  %v1268_v62 = vand.u32 4294901760, %v1267_v45  ;;  %vm258_vm7 = vcmp.eq.f32.partialorder %v3250_v51, inf  ;;  %v1272_v55 = vand.u32 4294901760, %v3116_v44  ;;  %v1284_v9 = vand.u32 4294901760, %v3134_v61 }
  0xb5   : > { %3861 = vst [vmem:[#allocation30_spill] sm:$0xff] %v3257_v7  ;;  %v3863_v1 = vand.u32 4294901760, %v3139_v15  ;;  %v3864_v54 = vand.u32 4294901760, %v3141_v17  ;;  %vm260_vm12 = vcmp.eq.f32.partialorder %v3250_v51, 0.0  ;;  %v578_v45 = vand.u32 4294901760, %v577_v33 }
  0xb6   : > { %v3282_v29 = vpack.c.bf16 %v1268_v62, %v1256_v39  ;;  %v590_v12 = vand.u32 4294901760, %v589_v2  ;;  %v3866_v25 = vand.u32 4294901760, %v3147_v19  ;;  %v1273_v18 = vsub.f32 %v3116_v44, %v1272_v55 }
  0xb7   : > { %v583_v36 = vsub.f32 %v3139_v15, %v3863_v1  ;;  %v595_v56 = vsub.f32 %v3141_v17, %v3864_v54  ;;  %v1285_v34 = vsub.f32 %v3134_v61, %v1284_v9  ;;  %v3867_v54 = vand.u32 4294901760, %v3159_v13 }
  0xb8   : > { %3865 = vst [vmem:[#allocation32_spill] sm:$0xff] %v3282_v29  ;;  %v1279_v60 = vsub.f32 %v3147_v19, %v3866_v25  ;;  %v3289_v23 = vpack.c.bf16 %v590_v12, %v578_v45  ;;  %v1274_v33 = vand.u32 4294901760, %v1273_v18  ;;  %v3869_v18 = vand.u32 4294901760, %v2868_v28 }
  0xb9   : > { %v584_v30 = vand.u32 4294901760, %v583_v36  ;;  %v596_v1 = vand.u32 4294901760, %v595_v56  ;;  %v1291_v39 = vsub.f32 %v3159_v13, %v3867_v54  ;;  %v1286_v2 = vand.u32 4294901760, %v1285_v34 }
  0xba   : > { %v1280_v7 = vand.u32 4294901760, %v1279_v60  ;;  %v3874_v54 = vand.u32 4294901760, %v2905_v40  ;;  %v3875_v60 = vand.u32 4294901760, %v2907_v41 }
  0xbb   : > { %v3296_v29 = vpack.c.bf16 %v596_v1, %v584_v30  ;;  %v1292_v32 = vand.u32 4294901760, %v1291_v39  ;;  %v3306_v56 = vpack.c.bf16 %v1286_v2, %v1274_v33  ;;  %v3868_v39 = vand.u32 4294901760, %v2866_v27 }
  0xbc   : > { %v2414_v33 = vpop.eup %2413  ;;  %v3870_v2 = vand.u32 4294901760, %v2875_v31  ;;  %v3871_v30 = vand.u32 4294901760, %v2939_v52  ;;  %v3355_v12 = vpack.c.bf16 %v3875_v60, %v3874_v54  ;;  %v3884_v60 = vand.u32 4294901760, %v2996_v21 }
  0xbd   : > { %v3314_v45 = vpack.c.bf16 %v1292_v32, %v1280_v7  ;;  %v257_v1 = vmul.f32 %v2414_v33, %v3250_v51  ;;  %v3337_v34 = vpack.c.bf16 %v3869_v18, %v3868_v39  ;;  %v3872_v7 = vand.u32 4294901760, %v2897_v37 }
  0xbe   : > { %v3343_v36 = vpack.c.bf16 %v3871_v30, %v3870_v2  ;;  %v3873_v32 = vand.u32 4294901760, %v2899_v38  ;;  %3876 = vst [vmem:[#allocation33_spill] sm:$0xff] %v3355_v12  ;;  %v3877_v18 = vand.u32 4294901760, %v2964_v57  ;;  %v3878_v39 = vand.u32 4294901760, %v2966_v58 }
  0xbf   : > { %v3880_v30 = vand.u32 4294901760, %v2968_v59  ;;  %v3881_v2 = vand.u32 4294901760, %v2973_v63  ;;  %v3886_v12 = vand.u32 4294901760, %v3002_v22 }
  0xc0   : > { %v3349_v33 = vpack.c.bf16 %v3873_v32, %v3872_v7  ;;  %v3361_v25 = vpack.c.bf16 %v3878_v39, %v3877_v18  ;;  %v259_v7 = vsel %vm258_vm7, %v3250_v51, %v257_v1  ;;  %v3883_v32 = vand.u32 4294901760, %v2994_v6  ;;  %vm3908_vm7 = vmmov %vm3848_vm14 }
  0xc1   : > { %v3367_v62 = vpack.c.bf16 %v3881_v2, %v3880_v30  ;;  %v3887_v18 = vand.u32 4294901760, %v3004_v24  ;;  %v3890_v30 = vand.u32 4294901760, %v3038_v8  ;;  %v262_v1 = vsel %vm260_vm12, %v261_v26, %v259_v7 }
  0xc2   : > { %3879 = vst [vmem:[#allocation34_spill] sm:$0xff] %v3361_v25  ;;  %v3376_v54 = vpack.c.bf16 %v3884_v60, %v3883_v32  ;;  %v3889_v25 = vand.u32 4294901760, %v3036_v4  ;;  %v3893_v32 = vand.u32 4294901760, %v3088_v48  ;;  %v264_v51 = vadd.f32 1e-07, %v262_v1 }
  0xc3   : > { %3882 = vst [vmem:[#allocation35_spill] sm:$0xff] %v3367_v62  ;;  %v3382_v39 = vpack.c.bf16 %v3887_v18, %v3886_v12  ;;  %v3892_v62 = vand.u32 4294901760, %v3044_v0  ;;  %v3896_v12 = vand.u32 4294901760, %v3067_v43  ;;  %v3901_v26 = vand.u32 4294901760, %v3108_v50 }
  0xc4   : > { %3885 = vst [vmem:[#allocation36_spill] sm:$0xff] %v3376_v54  ;;  %v3388_v2 = vpack.c.bf16 %v3890_v30, %v3889_v25  ;;  %v3895_v54 = vand.u32 4294901760, %v3065_v10  ;;  %v3899_v25 = vand.u32 4294901760, %v3075_v47  ;;  %v3902_v7 = vand.u32 4294901760, %v3110_v49 }
  0xc5   : > { %3888 = vst [vmem:[#allocation37_spill] sm:$0xff] %v3382_v39  ;;  %v3396_v60 = vpack.c.bf16 %v3893_v32, %v3892_v62  ;;  %v3898_v39 = vand.u32 4294901760, %v3073_v42  ;;  %v3416_v62 = vpack.c.bf16 %v1284_v9, %v1272_v55  ;;  %v3903_v32 = vand.u32 4294901760, %v3139_v15 }
  0xc6   : > { %3891 = vst [vmem:[#allocation38_spill] sm:$0xff] %v3388_v2  ;;  %v3402_v18 = vpack.c.bf16 %v3896_v12, %v3895_v54  ;;  %v3414_v2 = vpack.c.bf16 %v3902_v7, %v3901_v26  ;;  %v3904_v54 = vand.u32 4294901760, %v3141_v17  ;;  %2415 = vrcp.f32 %v264_v51 }
  0xc7   : > { %3894 = vst [vmem:[#allocation39_spill] sm:$0xff] %v3396_v60  ;;  %v3408_v30 = vpack.c.bf16 %v3899_v25, %v3898_v39  ;;  %v3907_v39 = vand.u32 4294901760, %v3159_v13  ;;  %vm263_vm6 = vcmp.gt.f32.partialorder %v262_v1, 1.0 }
  0xc8   : > { %3897 = vst [vmem:[#allocation40_spill] sm:$0xff] %v3402_v18  ;;  %v3422_v12 = vpack.c.bf16 %v3904_v54, %v3903_v32  ;;  %v3906_v18 = vand.u32 4294901760, %v3147_v19 }
  0xc9   : > { %3900 = vst [vmem:[#allocation41_spill] sm:$0xff] %v3408_v30 }
  0xca   : > { %3905 = vst [vmem:[#allocation42_spill] sm:$0xff] %v3422_v12  ;;  %v3428_v25 = vpack.c.bf16 %v3907_v39, %v3906_v18  ;;  %v3909_v39 = vmov 0.0  }
  0xd0   : > { %v2416_v30 = vpop.eup %2415 }
  0xd1   : > { %v267_v60 = vsel %vm263_vm6, %v2416_v30, 1.0 }
  0xd2   : > { %v268_v26 = vmul.f32 %v267_v60, %v2821_v11  ;;  %v269_v55 = vmul.f32 %v267_v60, %v2833_v16 }
  0xd4   : > { %v394_v9 = vsel %vm3848_vm14, %v268_v26, 0  ;;  %v397_v7 = vsel %vm3908_vm7, %v269_v55, 0  ;;  %v3910_v26 = vld [vmem:[#allocation31_spill] sm:$0xff] }
  0xd5   : > { %v3434_v32 = vand.u32 4294901760, %v394_v9  ;;  %v3436_v54 = vand.u32 4294901760, %v397_v7 }
  0xd7   : > { %v481_v12 = vsub.f32 %v394_v9, %v3434_v32  ;;  %v3440_v18 = vsub.f32 %v397_v7, %v3436_v54 }
  0xd9   : > { %v3442_v1 = vand.u32 4294901760, %v481_v12  ;;  %v3445_v30 = vand.u32 4294901760, %v3440_v18 }
  0xdb   : > { %v483_v11 = vsub.f32 %v481_v12, %v3442_v1  ;;  %v494_v16 = vsub.f32 %v3440_v18, %v3445_v30 }
  0xdd   : > { %v484_v60 = vand.u32 4294901760, %v483_v11  ;;  %v495_v51 = vand.u32 4294901760, %v494_v16 }
  0xdf   : > { %485 = vmatmul.mubr.f32.vlgmr.msra.gmra.mrb[0].mxu0 %v484_v60  ;;  %1181 = vmatmul.mubr.f32.vlgmr.msra.gmra.mrb[0].mxu1 %v484_v60 }
  0xe0   : > { %2133 = vmatpush1.bf16.msra.mxu0 %v3181_v35  ;;  %2229 = vmatpush1.bf16.msra.mxu1 %v3187_v14  ;;  %v3913_v35 = vpack.c.bf16 %v2868_v28, %v2866_v27  ;;  %v3914_v14 = vpack.c.bf16 %v2939_v52, %v2875_v31  ;;  %v3917_v27 = vpack.c.bf16 %v2966_v58, %v2964_v57 }
  0xe1   : > { %2135 = vmatprep.subr.bf16.mxu0 %v3217_v5  ;;  %2231 = vmatprep.subr.bf16.mxu1 %v3221_v46  ;;  %v3911_v5 = vld [vmem:[#allocation30_spill] sm:$0xff]  ;;  %v3912_v46 = vld [vmem:[#allocation32_spill] sm:$0xff]  ;;  %v3918_v28 = vpack.c.bf16 %v2973_v63, %v2968_v59  ;;  %v3919_v31 = vpack.c.bf16 %v2996_v21, %v2994_v6  ;;  %v3924_v52 = vpack.c.bf16 %v3075_v47, %v3073_v42  ;;  %v3929_v59 = vmov 1.0|1.0  }
  0xe2   : > { %490 = vmatprep.mubr.f32.mxu0 %v3909_v39  ;;  %1186 = vmatprep.mubr.f32.mxu1 %v3909_v39  ;;  %v3925_v57 = vpack.c.bf16 %v3110_v49, %v3108_v50  ;;  %v3927_v58 = vpack.c.bf16 %v3141_v17, %v3139_v15  ;;  %v3946_v49 = vld [vmem:[#allocation27_spill] sm:$0xff]  ;;  %v3950_v17 = vld [vmem:[#allocation33_spill] sm:$0xff]  ;;  %v3961_v6 = vlaneseq }
  0xe3   : > { %496 = vmatmul.mubr.f32.gmra.mrb[2].mxu0 %v495_v51  ;;  %1192 = vmatmul.mubr.f32.gmra.mrb[2].mxu1 %v495_v51  ;;  %vm3947_vm7 = vnez %v3946_v49 }
  0xe4   : > { %2137 = vmatpush1.bf16.msra.mxu0 %v3223_v20  ;;  %2233 = vmatpush1.bf16.msra.mxu1 %v3233_v3  ;;  %v3916_v20 = vpack.c.bf16 %v2907_v41, %v2905_v40  ;;  %v3922_v40 = vpack.c.bf16 %v3088_v48, %v3044_v0  ;;  %v3923_v41 = vpack.c.bf16 %v3067_v43, %v3065_v10  ;;  %v3940_v10 = vld [vmem:[#allocation24_spill] sm:$0xff]  ;;  %v3942_v48 = vld [vmem:[#allocation25_spill] sm:$0xff] }
  0xe5   : > { %2139 = vmatprep.subr.bf16.mxu0 %v3252_v53  ;;  %2235 = vmatprep.subr.bf16.mxu1 %v3910_v26  ;;  %v3926_v0 = vpack.c.bf16 %v3134_v61, %v3116_v44  ;;  %v3928_v43 = vpack.c.bf16 %v3159_v13, %v3147_v19  ;;  %vm3941_vm12 = vnez %v3940_v10  ;;  %vm3943_vm6 = vnez %v3942_v48  ;;  %v3944_v44 = vld [vmem:[#allocation26_spill] sm:$0xff]  ;;  %v3952_v13 = vld [vmem:[#allocation35_spill] sm:$0xff]  ;;  %v3953_v3 = vld [vmem:[#allocation36_spill] sm:$0xff] }
  0xe6   : > { %646 = vmatprep.mubr.f32.mxu0 %v3909_v39  ;;  %1342 = vmatprep.mubr.f32.mxu1 %v3909_v39  ;;  %vm3945_vm14 = vnez %v3944_v44  ;;  %v3951_v19 = vld [vmem:[#allocation34_spill] sm:$0xff]  ;;  %v3954_v53 = vld [vmem:[#allocation37_spill] sm:$0xff] }
  0xe8   : > { %2141 = vmatpush1.bf16.msra.mxu0 %v3911_v5  ;;  %2237 = vmatpush1.bf16.msra.mxu1 %v3912_v46 }
  0xe9   : > { %2143 = vmatprep.subr.bf16.mxu0 %v3289_v23  ;;  %2239 = vmatprep.subr.bf16.mxu1 %v3306_v56  ;;  %v3915_v23 = vpack.c.bf16 %v2899_v38, %v2897_v37  ;;  %v3920_v37 = vpack.c.bf16 %v3004_v24, %v3002_v22  ;;  %v3921_v38 = vpack.c.bf16 %v3038_v8, %v3036_v4  ;;  %v3957_v56 = vld [vmem:[#allocation40_spill] sm:$0xff] }
  0xec   : > { %2145 = vmatpush1.bf16.msra.mxu0 %v3296_v29  ;;  %2241 = vmatpush1.bf16.msra.mxu1 %v3314_v45  ;;  %v3955_v29 = vld [vmem:[#allocation38_spill] sm:$0xff] }
  0xed   : > { %2147 = vmatprep.subr.bf16.mxu0 %v3913_v35  ;;  %2243 = vmatprep.subr.bf16.mxu1 %v3914_v14  ;;  %v3959_v45 = vld [vmem:[#allocation42_spill] sm:$0xff] }
  0xef   : > { %648 = vmatmul.mubr.f32.vlgmr.msra.gmra.mrb[0].mxu0 %v3434_v32  ;;  %1344 = vmatmul.mubr.f32.vlgmr.msra.gmra.mrb[0].mxu1 %v3434_v32 }
  0xf0   : > { %2149 = vmatpush1.bf16.msra.mxu0 %v3915_v23  ;;  %2245 = vmatpush1.bf16.msra.mxu1 %v3916_v20 }
  0xf1   : > { %2151 = vmatprep.subr.bf16.mxu0 %v3917_v27  ;;  %2247 = vmatprep.subr.bf16.mxu1 %v3918_v28 }
  0xf2   : > { %653 = vmatprep.mubr.f32.mxu0 %v3909_v39  ;;  %1349 = vmatprep.mubr.f32.mxu1 %v3909_v39 }
  0xf3   : > { %655 = vmatmul.mubr.f32.gmra.mrb[2].mxu0 %v3436_v54  ;;  %1351 = vmatmul.mubr.f32.gmra.mrb[2].mxu1 %v3436_v54 }
  0xf4   : > { %2153 = vmatpush1.bf16.msra.mxu0 %v3919_v31  ;;  %2249 = vmatpush1.bf16.msra.mxu1 %v3920_v37 }
  0xf5   : > { %2155 = vmatprep.subr.bf16.mxu0 %v3921_v38  ;;  %2251 = vmatprep.subr.bf16.mxu1 %v3922_v40 }
  0xf6   : > { %757 = vmatprep.mubr.f32.mxu0 %v3909_v39  ;;  %1453 = vmatprep.mubr.f32.mxu1 %v3909_v39 }
  0xf8   : > { %2157 = vmatpush1.bf16.msra.mxu0 %v3923_v41  ;;  %2253 = vmatpush1.bf16.msra.mxu1 %v3924_v52  ;;  %v2596_v52 = vmov 1966171168  }
  0xf9   : > { %2159 = vmatprep.subr.bf16.mxu0 %v3925_v57  ;;  %2255 = vmatprep.subr.bf16.mxu1 %v3926_v0  ;;  %v1825_v57 = vunpack.c.l.s4 %v2596_v52 }
  0xfb   : > { %v1826_v0 = vunpack.c.0.s8 %v1825_v57 }
  0xfc   : > { %2161 = vmatpush1.bf16.msra.mxu0 %v3927_v58  ;;  %2257 = vmatpush1.bf16.msra.mxu1 %v3928_v43  ;;  %v3960_v43 = vld [vmem:[#allocation13_spill] sm:$0xff] }
  0xfd   : > { %2163 = vmatprep.subr.msk.bf16.mxu0 %vm2854_vm4, %v3929_v59  ;;  %2259 = vmatprep.subr.msk.bf16.mxu1 %vm2871_vm5, %v3929_v59 }
  0xff   : > { %760 = vmatmul.mubr.f32.vlgmr.msra.gmra.mrb[0].mxu0 %v481_v12  ;;  %1456 = vmatmul.mubr.f32.vlgmr.msra.gmra.mrb[0].mxu1 %v481_v12 }
 0x100   : > { %2165 = vmatpush1.bf16.msk.msra.mxu0 %vm2888_vm10, %v3929_v59  ;;  %2261 = vmatpush1.bf16.msk.msra.mxu1 %vm2901_vm11, %v3929_v59 }
 0x101   : > { %2167 = vmatprep.subr.msk.bf16.mxu0 %vm2924_vm0, %v3929_v59  ;;  %2263 = vmatprep.subr.msk.bf16.mxu1 %vm2935_vm1, %v3929_v59 }
 0x102   : > { %765 = vmatprep.mubr.f32.mxu0 %v3909_v39  ;;  %1461 = vmatprep.mubr.f32.mxu1 %v3909_v39 }
 0x103   : > { %768 = vmatmul.mubr.f32.gmra.mrb[2].mxu0 %v3440_v18  ;;  %1464 = vmatmul.mubr.f32.gmra.mrb[2].mxu1 %v3440_v18 }
 0x104   : > { %2169 = vmatpush1.bf16.msk.msra.mxu0 %vm2985_vm8, %v3929_v59  ;;  %2265 = vmatpush1.bf16.msk.msra.mxu1 %vm2998_vm9, %v3929_v59 }
 0x105   : > { %2171 = vmatprep.subr.msk.bf16.mxu0 %vm3021_vm2, %v3929_v59  ;;  %2267 = vmatprep.subr.msk.bf16.mxu1 %vm3032_vm3, %v3929_v59 }
 0x106   : > { %854 = vmatprep.mubr.f32.mxu0 %v3909_v39  ;;  %1550 = vmatprep.mubr.f32.mxu1 %v3909_v39 }
 0x108   : > { %2173 = vmatpush1.bf16.msk.msra.mxu0 %vm3941_vm12, %v3929_v59  ;;  %2269 = vmatpush1.bf16.msk.msra.mxu1 %vm3943_vm6, %v3929_v59 }
 0x109   : > { %2175 = vmatprep.subr.msk.bf16.mxu0 %vm3945_vm14, %v3929_v59  ;;  %2271 = vmatprep.subr.msk.bf16.mxu1 %vm3947_vm7, %v3929_v59 }
 0x10c   : > { %2177 = vmatpush1.bf16.msk.msra.mxu0 %vm3128_vm13, %v3929_v59  ;;  %2273 = vmatpush1.bf16.msk.msra.mxu1 %vm3143_vm15, %v3929_v59 }
 0x10d   : > { %2179 = vmatprep.subr.bf16.mxu0 %v3337_v34  ;;  %2275 = vmatprep.subr.bf16.mxu1 %v3343_v36  ;;  %v3956_v36 = vld [vmem:[#allocation39_spill] sm:$0xff]  ;;  %v3958_v34 = vld [vmem:[#allocation41_spill] sm:$0xff] }
 0x10f   : > { %858 = vmatmul.mubr.f32.vlgmr.msra.gmra.mrb[0].mxu0 %v3442_v1  ;;  %1554 = vmatmul.mubr.f32.vlgmr.msra.gmra.mrb[0].mxu1 %v3442_v1 }
 0x110   : > { %2181 = vmatpush1.bf16.msra.mxu0 %v3349_v33  ;;  %2277 = vmatpush1.bf16.msra.mxu1 %v3950_v17 }
 0x111   : > { %2183 = vmatprep.subr.bf16.mxu0 %v3951_v19  ;;  %2279 = vmatprep.subr.bf16.mxu1 %v3952_v13 }
 0x112   : > { %863 = vmatprep.mubr.f32.mxu0 %v3909_v39  ;;  %1559 = vmatprep.mubr.f32.mxu1 %v3909_v39 }
 0x113   : > { %867 = vmatmul.mubr.f32.gmra.mrb[2].mxu0 %v3445_v30  ;;  %1563 = vmatmul.mubr.f32.gmra.mrb[2].mxu1 %v3445_v30 }
 0x114   : > { %2185 = vmatpush1.bf16.msra.mxu0 %v3953_v3  ;;  %2281 = vmatpush1.bf16.msra.mxu1 %v3954_v53 }
 0x115   : > { %2187 = vmatprep.subr.bf16.mxu0 %v3955_v29  ;;  %2283 = vmatprep.subr.bf16.mxu1 %v3956_v36 }
 0x116   : > { %985 = vmatprep.mubr.f32.mxu0 %v3909_v39  ;;  %1681 = vmatprep.mubr.f32.mxu1 %v3909_v39 }
 0x118   : > { %2189 = vmatpush1.bf16.msra.mxu0 %v3957_v56  ;;  %2285 = vmatpush1.bf16.msra.mxu1 %v3958_v34 }
 0x119   : > { %2191 = vmatprep.subr.bf16.mxu0 %v3414_v2  ;;  %2287 = vmatprep.subr.bf16.mxu1 %v3416_v62 }
 0x11c   : > { %2193 = vmatpush1.bf16.msra.mxu0 %v3959_v45  ;;  %2289 = vmatpush1.bf16.msra.mxu1 %v3428_v25 }
 0x11d   : > { %2195 = vmatprep.subr.msk.bf16.mxu0 %vm2854_vm4, %v3929_v59  ;;  %2291 = vmatprep.subr.msk.bf16.mxu1 %vm2871_vm5, %v3929_v59  ;;  %vm1841_vm4 = vcmp.lt.s32.totalorder %v3961_v6, 256 }
 0x11f   : > { %987 = vmatmul.mubr.f32.vlgmr.msra.gmra.mrb[0].mxu0 %v3434_v32  ;;  %1683 = vmatmul.mubr.f32.vlgmr.msra.gmra.mrb[0].mxu1 %v3434_v32 }
 0x120   : > { %2197 = vmatpush1.bf16.msk.msra.mxu0 %vm2888_vm10, %v3929_v59  ;;  %2293 = vmatpush1.bf16.msk.msra.mxu1 %vm2901_vm11, %v3929_v59 }
 0x121   : > { %2199 = vmatprep.subr.msk.bf16.mxu0 %vm2924_vm0, %v3929_v59  ;;  %2295 = vmatprep.subr.msk.bf16.mxu1 %vm2935_vm1, %v3929_v59 }
 0x122   : > { %992 = vmatprep.mubr.f32.mxu0 %v3909_v39  ;;  %1688 = vmatprep.mubr.f32.mxu1 %v3909_v39 }
 0x123   : > { %994 = vmatmul.mubr.f32.gmra.mrb[2].mxu0 %v3436_v54  ;;  %1690 = vmatmul.mubr.f32.gmra.mrb[2].mxu1 %v3436_v54 }
 0x124   : > { %2201 = vmatpush1.bf16.msk.msra.mxu0 %vm2985_vm8, %v3929_v59  ;;  %2297 = vmatpush1.bf16.msk.msra.mxu1 %vm2998_vm9, %v3929_v59 }
 0x125   : > { %2203 = vmatprep.subr.msk.bf16.mxu0 %vm3021_vm2, %v3929_v59  ;;  %2299 = vmatprep.subr.msk.bf16.mxu1 %vm3032_vm3, %v3929_v59 }
 0x126   : > { %1080 = vmatprep.mubr.f32.mxu0 %v3909_v39  ;;  %1776 = vmatprep.mubr.f32.mxu1 %v3909_v39 }
 0x128   : > { %2205 = vmatpush1.bf16.msk.msra.mxu0 %vm3941_vm12, %v3929_v59  ;;  %2301 = vmatpush1.bf16.msk.msra.mxu1 %vm3943_vm6, %v3929_v59 }
 0x129   : > { %2207 = vmatprep.subr.msk.bf16.mxu0 %vm3945_vm14, %v3929_v59  ;;  %2303 = vmatprep.subr.msk.bf16.mxu1 %vm3947_vm7, %v3929_v59 }
 0x12c   : > { %2209 = vmatpush1.bf16.msk.msra.mxu0 %vm3128_vm13, %v3929_v59  ;;  %2305 = vmatpush1.bf16.msk.msra.mxu1 %vm3143_vm15, %v3929_v59  ;;  %v1829_v59 = vsub.s32 %v1826_v0, %v3960_v43 }
 0x12f   : > { %1082 = vmatmul.mubr.f32.vlgmr.msra.gmra.mrb[0].mxu0 %v3434_v32  ;;  %1778 = vmatmul.mubr.f32.vlgmr.msra.gmra.mrb[0].mxu1 %v3434_v32 }
 0x130   : > { %1087 = vmatprep.mubr.f32.mxu0 %v3909_v39  ;;  %1783 = vmatprep.mubr.f32.mxu1 %v3909_v39 }
 0x133   : > { %1089 = vmatmul.mubr.f32.gmra.mrb[2].mxu0 %v3436_v54  ;;  %1785 = vmatmul.mubr.f32.gmra.mrb[2].mxu1 %v3436_v54 }
 0x202   : > { %v1083_v33 = vpop.f32.mrb[0].mxu0  ;;  %v1779_v2 = vpop.f32.mrb[0].mxu1 }
 0x203   : > { %v1791_v62 = vmul.f32 %v1779_v2, %v1083_v33  ;;  %v1085_v12 = vpop.f32.mrb[1].mxu0  ;;  %v1781_v25 = vpop.f32.mrb[1].mxu1 }
 0x204   : > { %v1792_v55 = vmul.f32 %v1781_v25, %v1085_v12 }
 0x206   : > { %v1090_v9 = vpop.f32.mrb[2].mxu0  ;;  %v1786_v7 = vpop.f32.mrb[2].mxu1 }
 0x207   : > { %v1793_v18 = vmul.f32 %v1786_v7, %v1090_v9  ;;  %v1092_v1 = vpop.f32.mrb[3].mxu0  ;;  %v1788_v30 = vpop.f32.mrb[3].mxu1 }
 0x208   : > { %v1794_v32 = vmul.f32 %v1788_v30, %v1092_v1 }
 0x209   : > { %v1795_v11 = vadd.f32 %v1793_v18, %v1791_v62 }
 0x20a   : > { %v1802_v16 = vadd.f32 %v1794_v32, %v1792_v55 }
 0x20b   : > { %v1796_v60 = vrot.slane %v1795_v11, 4 }
 0x20c   : > { %v1803_v51 = vrot.slane %v1802_v16, 4 }
 0x20d   : > { %v1797_v39 = vadd.f32 %v1796_v60, %v1795_v11 }
 0x20e   : > { %v1804_v26 = vadd.f32 %v1803_v51, %v1802_v16 }
 0x20f   : > { %v1798_v5 = vrot.slane %v1797_v39, 2 }
 0x210   : > { %v1805_v54 = vrot.slane %v1804_v26, 2 }
 0x211   : > { %v1799_v46 = vadd.f32 %v1798_v5, %v1797_v39 }
 0x212   : > { %v1806_v35 = vadd.f32 %v1805_v54, %v1804_v26 }
 0x213   : > { %v1800_v14 = vrot.slane %v1799_v46, 1 }
 0x214   : > { %v1807_v23 = vrot.slane %v1806_v35, 1 }
 0x215   : > { %v1801_v20 = vadd.f32 %v1800_v14, %v1799_v46 }
 0x216   : > { %v1808_v27 = vadd.f32 %v1807_v23, %v1806_v35 }
 0x217   : > { %v2104_v28 = vmul.f32 -1.442695, %v1801_v20 }
 0x218   : > { %v2105_v31 = vmul.f32 -1.442695, %v1808_v27 }
 0x219   : > { %2417 = vpow2.f32 %v2104_v28 }
 0x21a   : > { %2419 = vpow2.f32 %v2105_v31 }
 0x223   : > { %v2418_v37 = vpop.eup %2417 }
 0x224   : > { %v2420_v38 = vpop.eup %2419  ;;  %v1815_v40 = vadd.f32 1.0, %v2418_v37 }
 0x225   : > { %v1816_v41 = vadd.f32 1.0, %v2420_v38 }
 0x226   : > { %2421 = vrcp.f32 %v1815_v40 }
 0x227   : > { %2423 = vrcp.f32 %v1816_v41 }
 0x230   : > { %v2422_v58 = vpop.eup %2421 }
 0x231   : > { %v2424_v63 = vpop.eup %2423 }
 0x232   : > { %v1823_v42 = vcombine.low %v2422_v58, %v2424_v63 }
 0x234   : > { %v1830_v61 = vrot.slane %v1823_v42, %v1829_v59 }
 0x236   : > { %v1837_v21 = vrot.slane %v1830_v61, %v1829_v59 }
 0x238   : > { %1843 = vst.msk [vmem:[%s238_s11] sm:$0x3] %vm1841_vm4, %v1837_v21 }
 0x239   : > { %2526 = shalt.err (!%p2523_p1)
}
 0x23a   : > { %s2527_s8 = scalar_lea.hbm %s3671_s5, 32  ;;  %s2531_s30 = scalar_lea.hbm %s3718_s3, 64 }
 0x23b   : > { %p2528_p6 = scmp.ne.s32.totalorder %s3671_s5, %s2527_s8  ;;  %p2532_p12 = scmp.lt.u32.totalorder %s3671_s5, %s3718_s3 }
 0x23c   : > { %p2533_p11 = scmp.lt.u32.totalorder %s2531_s30, %s2527_s8  ;;  %p2535_p10 = scmp.lt.u32.totalorder %s2527_s8, %s3671_s5 }
 0x23d   : > { %p2529_p8 = pnand %p2528_p6, %p3962_p13 }
 0x23e   : > { %p2534_p0 = por %p2533_p11, %p2532_p12 }
 0x23f   : > { %p2530_p4 = pneg %p2529_p8 }
 0x240   : > { %p2536_p3 = por %p2535_p10, %p2534_p0 }
 0x242   : > { %p2537_p7 = pnand %p2536_p3, %p2530_p4 }
 0x244   : > { %2540 = shalt.err (!%p2537_p7)
}
 0x245   : > { %2354 = dma.vmem_to_hbm [thread:$0]  (%p3962_p13), %s3673_s23, 32, %s3671_s5, %s1845_s6  }
 0x246 PF: > { %s1871_s4 = sand.u32 1, %s2575_s12   ;;  %p3963_p9 = scmp.ne.s32.totalorder %s3787_s19, 0 }
 0x247   : > { %p3964_p2 = scmp.ge.s32.totalorder %s2587_s15, 2  ;;  %s1872_s7 = scalar_lea.sflag [#allocation4], %s1871_s4 }
 0x249   : > { %p2368_p5 = pnand %p3964_p2, %p3963_p9 }
 0x24b   : > { %2570 = dma.done.wait (!%p2368_p5), %s1872_s7, 32  }
 0x24c   : > { %2572 = vsyncadd (!%p2368_p5), %s1872_s7, 4294967264  ;;  %p19_p1 = scmp.ge.s32.totalorder %s2674_s24, 4   ;;  %s3965_s12 = smov %s2579_s13 }
 0x24d   : > { %s3966_s13 = smov %s2583_s14  ;;  %s3967_s14 = smov %s2705_s17 }
 0x24e   : > { %s3968_s15 = smov %s2674_s24  ;;  %21 = sbr.rel (!%p19_p1) target bundleno = 7 (0x7), region = 94 }
 0x255   :  { %1877 = vsyncpa [#allocation3], 1 }
 0x256   :  { %1879 = vsyncpa [#allocation3 + $0x1], 1 }
 0x257   :  { %1880 = vsyncpa [#allocation6], 1 }
 0x258   :  { %1882 = vsyncpa [#allocation6 + $0x1], 1 }
 0x259   :  { %1883 = vsyncpa [#allocation4], 1 }
 0x25a   :  { %1885 = vsyncpa [#allocation4 + $0x1], 1 }

</bundles_post_ra>
